<compile_context>
chip_gen: v5e
topology: v5e:2x2
jax: 0.10.0
libtpu: 0.0.40
codegen_flags: <defaults>
</compile_context>

<pallas_src>
import functools

import jax
import jax.numpy as jnp
from jax.experimental import pallas as pl
from jax.experimental.pallas import tpu as pltpu


_PARALLEL = pltpu.CompilerParams(dimension_semantics=("parallel",))

_LANE = 128      # vreg lane width: output columns padded to a multiple of this
_SUBLANE = 8     # vreg sublane width: batch tiles are multiples of this


def _round_up(x, m):
    return (x + m - 1) // m * m


def _cdiv(a, b):
    return -(-a // b)


def _pad_rows(x, rows):
    pad = rows - x.shape[0]
    if pad == 0:
        return x
    return jnp.pad(x, ((0, pad), (0, 0)))


def _batch_tile(batch, bytes_per_row):
    """Return (tile, padded_batch).

    * batch padded only to a multiple of 8; grid uses cdiv so the last tile
      may be partial (no round-up-to-tile HBM copy).
    * tile is as large as a conservative double-buffered VMEM budget allows
      (per grid step costs ~0.35us of fixed overhead, and per-tile compute is
      tiny here), capped at 2048 rows -> fits easily even in v7x's 64 MiB VMEM.
    * if the whole batch would fit in one tile but is big enough to split,
      force >=2 grid steps so both v7x TensorCores get work.
    """
    padded = _round_up(max(batch, 1), _SUBLANE)
    budget = 4 * 1024 * 1024                      # double-buffered I/O tiles
    cap = max(_SUBLANE,
              (budget // (2 * max(bytes_per_row, 1))) // _SUBLANE * _SUBLANE)
    cap = min(cap, 2048)
    tile = min(cap, padded)
    if padded > _SUBLANE and tile >= padded:
        tile = _round_up(_cdiv(padded, 2), _SUBLANE)
    return tile, padded


# ---------------------------------------------------------------------------
# Kernels
# ---------------------------------------------------------------------------

def _phi_kernel(x_ref, w1_ref, b1_ref, w2_ref, b2_ref, o_ref):
    """phi = relu(x @ W1 + b1) @ W2 + b2 for one batch tile (action=None)."""
    h = jnp.dot(x_ref[...], w1_ref[...], preferred_element_type=jnp.float32)
    h = jnp.maximum(h + b1_ref[...], 0.0)
    o = jnp.dot(h.astype(w2_ref.dtype), w2_ref[...],
                preferred_element_type=jnp.float32)
    o_ref[...] = (o + b2_ref[...]).astype(o_ref.dtype)


def _fused_kernel(x_ref, a_ref, w1s_ref, w1a_ref, b1_ref,
                  w2f_ref, b2f_ref, w2s_ref, b2s_ref, o_ref,
                  *, action_is_int, action_dim, hidden_dim):
    """Fused feature_net + sf_net for one batch tile.

    Packed layout (built once in the wrapper):
      w1s : (S, 2H)  = [ W1_feat | W1_sf[:S] ]      (columns [0:H] feature net)
      w1a : (A, 2H)  = [ 0       | W1_sf[S:] ]      (zero on the phi half)
      b1  : (1, 2H)  = [ b1_feat | b1_sf ]
      w2f : (H, F_pad), b2f : (1, F_pad)            (F_pad = roundup(F, 128))
      w2s : (H, F_pad), b2s : (1, F_pad)
    Output slab: (tile, 2*F_pad) = [ phi_pad | sf_pad ], lane-dense stores.
    """
    x = x_ref[...]
    if action_is_int:
        a = a_ref[...]                                          # (tile, 1) int32
        iota = jax.lax.broadcasted_iota(jnp.int32, (x.shape[0], action_dim), 1)
        oh = (iota == a).astype(x.dtype)                        # in-kernel one-hot
    else:
        oh = a_ref[...]                                         # (tile, A) features

    # First layer: packed over both nets along N; state and action parts are
    # separate operands (two matmuls + one VPU add).
    h = jnp.dot(x, w1s_ref[...], preferred_element_type=jnp.float32)
    h = h + jnp.dot(oh, w1a_ref[...], preferred_element_type=jnp.float32)
    h = jnp.maximum(h + b1_ref[...], 0.0)                       # ReLU, f32 VPU

    # Second layer: separate per-net weights (no block-diagonal zeros).
    hdim = hidden_dim
    h2 = h.astype(w2f_ref.dtype)
    phi = jnp.dot(h2[:, :hdim], w2f_ref[...], preferred_element_type=jnp.float32)
    sf = jnp.dot(h2[:, hdim:], w2s_ref[...], preferred_element_type=jnp.float32)

    fpad = w2f_ref.shape[1]                                     # multiple of 128
    o_ref[:, :fpad] = (phi + b2f_ref[...]).astype(o_ref.dtype)
    o_ref[:, fpad:] = (sf + b2s_ref[...]).astype(o_ref.dtype)


# ---------------------------------------------------------------------------
# Host wrappers (jitted)
# ---------------------------------------------------------------------------

def _phi_forward(state, w1, b1, w2p, b2p, *, feature_dim, param_dtype):
    batch, state_dim = state.shape
    if batch == 0:
        return jnp.zeros((0, feature_dim), jnp.float32)

    fpad = w2p.shape[1]
    hidden = w1.shape[1]
    tile, padded = _batch_tile(batch, (state_dim + fpad) * 4)
    xp = _pad_rows(state, padded).astype(param_dtype)

    weight_bytes = sum(w.size * w.dtype.itemsize for w in (w1, b1, w2p, b2p))
    cost = pl.CostEstimate(
        flops=2 * padded * (state_dim * hidden + hidden * fpad),
        transcendentals=0,
        bytes_accessed=(xp.size * xp.dtype.itemsize + weight_bytes
                        + padded * fpad * 4),
    )

    out = pl.pallas_call(
        _phi_kernel,
        out_shape=jax.ShapeDtypeStruct((padded, fpad), jnp.float32),
        grid=(_cdiv(padded, tile),),
        in_specs=[
            pl.BlockSpec((tile, state_dim), lambda i: (i, 0)),
            pl.BlockSpec(w1.shape, lambda i: (0, 0)),   # weights stay resident
            pl.BlockSpec(b1.shape, lambda i: (0, 0)),
            pl.BlockSpec(w2p.shape, lambda i: (0, 0)),
            pl.BlockSpec(b2p.shape, lambda i: (0, 0)),
        ],
        out_specs=pl.BlockSpec((tile, fpad), lambda i: (i, 0)),
        compiler_params=_PARALLEL,
        cost_estimate=cost,
    )(xp, w1, b1, w2p, b2p)
    return out[:batch, :feature_dim]


def _fused_forward(state, action, w1s, w1a, b1, w2f, b2f, w2s, b2s, *,
                   action_is_int, action_dim, hidden_dim, feature_dim,
                   param_dtype):
    batch, state_dim = state.shape
    if batch == 0:
        z = jnp.zeros((0, feature_dim), jnp.float32)
        return z, z

    fpad = w2f.shape[1]
    out_cols = 2 * fpad

    if action_is_int:
        a2 = action.reshape(batch, 1).astype(jnp.int32)
    else:
        a2 = action.astype(param_dtype)
    a_cols = a2.shape[1]

    tile, padded = _batch_tile(batch, (state_dim + a_cols + out_cols) * 4)
    xp = _pad_rows(state, padded).astype(param_dtype)
    ap = _pad_rows(a2, padded)

    kern = functools.partial(_fused_kernel, action_is_int=action_is_int,
                             action_dim=action_dim, hidden_dim=hidden_dim)

    weight_bytes = sum(w.size * w.dtype.itemsize
                       for w in (w1s, w1a, b1, w2f, b2f, w2s, b2s))
    cost = pl.CostEstimate(
        flops=2 * padded * ((2 * state_dim + action_dim) * hidden_dim
                            + 2 * hidden_dim * fpad),
        transcendentals=0,
        bytes_accessed=(xp.size * xp.dtype.itemsize
                        + ap.size * ap.dtype.itemsize
                        + weight_bytes + padded * out_cols * 4),
    )

    out = pl.pallas_call(
        kern,
        out_shape=jax.ShapeDtypeStruct((padded, out_cols), jnp.float32),
        grid=(_cdiv(padded, tile),),
        in_specs=[
            pl.BlockSpec((tile, state_dim), lambda i: (i, 0)),
            pl.BlockSpec((tile, a_cols), lambda i: (i, 0)),
            pl.BlockSpec(w1s.shape, lambda i: (0, 0)),
            pl.BlockSpec(w1a.shape, lambda i: (0, 0)),
            pl.BlockSpec(b1.shape, lambda i: (0, 0)),
            pl.BlockSpec(w2f.shape, lambda i: (0, 0)),
            pl.BlockSpec(b2f.shape, lambda i: (0, 0)),
            pl.BlockSpec(w2s.shape, lambda i: (0, 0)),
            pl.BlockSpec(b2s.shape, lambda i: (0, 0)),
        ],
        out_specs=pl.BlockSpec((tile, out_cols), lambda i: (i, 0)),
        compiler_params=_PARALLEL,
        cost_estimate=cost,
    )(xp, ap, w1s, w1a, b1, w2f, b2f, w2s, b2s)

    phi = out[:batch, :feature_dim]
    sf = out[:batch, fpad:fpad + feature_dim]
    return phi, sf


# ---------------------------------------------------------------------------
# Module
# ---------------------------------------------------------------------------

def init_linear(key, in_dim, out_dim):
    """Deterministic init mimicking torch.nn.Linear (uniform +/- 1/sqrt(fan_in))."""
    kw, kb = jax.random.split(key)
    bound = 1.0 / jnp.sqrt(jnp.float32(in_dim))
    w = jax.random.uniform(kw, (in_dim, out_dim), jnp.float32, -bound, bound)
    b = jax.random.uniform(kb, (1, out_dim), jnp.float32, -bound, bound)
    return w, b


class SuccessorFeatureNetworkPallas:
    def __init__(self, state_dim, action_dim, feature_dim, hidden_dim, key,
                 use_bf16=False):
        self.state_dim = state_dim
        self.action_dim = action_dim
        self.feature_dim = feature_dim
        self.hidden_dim = hidden_dim
        self.param_dtype = jnp.bfloat16 if use_bf16 else jnp.float32

        k1, k2, k3, k4 = jax.random.split(key, 4)
        # feature_net: Linear(S, H) -> ReLU -> Linear(H, F)
        self.f_w1, self.f_b1 = init_linear(k1, state_dim, hidden_dim)
        self.f_w2, self.f_b2 = init_linear(k2, hidden_dim, feature_dim)
        # sf_net: Linear(S + A, H) -> ReLU -> Linear(H, F)
        self.s_w1, self.s_b1 = init_linear(k3, state_dim + action_dim, hidden_dim)
        self.s_w2, self.s_b2 = init_linear(k4, hidden_dim, feature_dim)

        H, F, S, A = hidden_dim, feature_dim, state_dim, action_dim
        F_pad = _round_up(F, _LANE)
        pd = self.param_dtype

        def pad_cols(w):
            return jnp.pad(w, ((0, 0), (0, F_pad - F)))

        # First layer packed over both nets along N (cols [0:H] = feature_net,
        # cols [H:2H] = sf_net); state rows and action rows are separate
        # operands so the int-action one-hot contributes via a tiny matmul.
        self.p_w1s = jnp.concatenate([self.f_w1, self.s_w1[:S]], axis=1).astype(pd)   # (S, 2H)
        self.p_w1a = jnp.concatenate(
            [jnp.zeros((A, H), jnp.float32), self.s_w1[S:]], axis=1).astype(pd)       # (A, 2H)
        self.p_b1 = jnp.concatenate([self.f_b1, self.s_b1], axis=1)                   # (1, 2H) f32
        # Second layer per-net, zero-padded to a lane-dense 128-multiple width.
        self.p_w2f = pad_cols(self.f_w2).astype(pd)    # (H, F_pad)
        self.p_b2f = pad_cols(self.f_b2)               # (1, F_pad) f32
        self.p_w2s = pad_cols(self.s_w2).astype(pd)    # (H, F_pad)
        self.p_b2s = pad_cols(self.s_b2)               # (1, F_pad) f32
        # phi-only path weights (lane-dense output as well).
        self.q_w1 = self.f_w1.astype(pd)
        self.q_b1 = self.f_b1
        self.q_w2 = self.p_w2f
        self.q_b2 = self.p_b2f

        # One jitted executable per forward flavor.
        self._phi_fn = jax.jit(functools.partial(
            _phi_forward, feature_dim=F, param_dtype=pd))
        self._fused_int = jax.jit(functools.partial(
            _fused_forward, action_is_int=True, action_dim=A, hidden_dim=H,
            feature_dim=F, param_dtype=pd))
        self._fused_float = jax.jit(functools.partial(
            _fused_forward, action_is_int=False, action_dim=A, hidden_dim=H,
            feature_dim=F, param_dtype=pd))

    def __call__(self, state, action=None):
        if action is None:
            return self._phi_fn(state, self.q_w1, self.q_b1, self.q_w2, self.q_b2)
        if action.ndim == 1:
            return self._fused_int(state, action, self.p_w1s, self.p_w1a,
                                   self.p_b1, self.p_w2f, self.p_b2f,
                                   self.p_w2s, self.p_b2s)
        # Action already given as (B, action_dim) features (e.g. a one-hot).
        return self._fused_float(state, action, self.p_w1s, self.p_w1a,
                                 self.p_b1, self.p_w2f, self.p_b2f,
                                 self.p_w2s, self.p_b2s)


if __name__ == "__main__":
    state_dim = 16
    action_dim = 4
    feature_dim = 8
    hidden_dim = 32

    root = jax.random.PRNGKey(0)
    k_params, k_state, k_action, k_state_b, k_action_b = jax.random.split(root, 5)

    net = SuccessorFeatureNetworkPallas(state_dim, action_dim, feature_dim,
                                        hidden_dim, k_params)

    # Pure-JAX reference of the same math.
    def ref_mlp(x, w1, b1, w2, b2):
        return jnp.maximum(x @ w1 + b1, 0.0) @ w2 + b2

    def ref_forward(state, action_oh):
        phi = ref_mlp(state, net.f_w1, net.f_b1, net.f_w2, net.f_b2)
        sa = jnp.concatenate([state, action_oh], axis=1)
        sf = ref_mlp(sa, net.s_w1, net.s_b1, net.s_w2, net.s_b2)
        return phi, sf

    # --- small batch (batch=2), int / None / one-hot action flavors --------
    batch = 2
    state = jax.random.normal(k_state, (batch, state_dim), dtype=jnp.float32)
    action = jax.random.randint(k_action, (batch,), 0, action_dim, dtype=jnp.int32)
    action_oh = jax.nn.one_hot(action, action_dim, dtype=jnp.float32)

    phi, sf = net(state, action)                 # fused, in-kernel one-hot
    jax.block_until_ready((phi, sf))
    phi_only = net(state)                        # phi-only path
    jax.block_until_ready(phi_only)
    phi2, sf2 = net(state, action_oh)            # fused, float action features
    jax.block_until_ready((phi2, sf2))

    phi_ref, sf_ref = ref_forward(state, action_oh)
    assert phi.shape == (batch, feature_dim)
    assert sf.shape == (batch, feature_dim)
    assert jnp.allclose(phi, phi_ref, atol=1e-5, rtol=1e-5)
    assert jnp.allclose(sf, sf_ref, atol=1e-5, rtol=1e-5)
    assert jnp.allclose(phi_only, phi_ref, atol=1e-5, rtol=1e-5)
    assert jnp.allclose(phi2, phi_ref, atol=1e-5, rtol=1e-5)
    assert jnp.allclose(sf2, sf_ref, atol=1e-5, rtol=1e-5)

    # --- odd-size batch (37): exercises pad-to-8, cdiv grid, 2-step split --
    batch_b = 37
    state_b = jax.random.normal(k_state_b, (batch_b, state_dim), dtype=jnp.float32)
    action_b = jax.random.randint(k_action_b, (batch_b,), 0, action_dim,
                                  dtype=jnp.int32)
    action_b_oh = jax.nn.one_hot(action_b, action_dim, dtype=jnp.float32)

    phi_b, sf_b = net(state_b, action_b)
    phi_only_b = net(state_b)
    jax.block_until_ready((phi_b, sf_b, phi_only_b))

    phi_b_ref, sf_b_ref = ref_forward(state_b, action_b_oh)
    assert phi_b.shape == (batch_b, feature_dim)
    assert sf_b.shape == (batch_b, feature_dim)
    assert jnp.allclose(phi_b, phi_b_ref, atol=1e-5, rtol=1e-5)
    assert jnp.allclose(sf_b, sf_b_ref, atol=1e-5, rtol=1e-5)
    assert jnp.allclose(phi_only_b, phi_b_ref, atol=1e-5, rtol=1e-5)

    # --- bf16-operand variant (v5e/v6e DMA-byte optimization), loose check --
    net_bf16 = SuccessorFeatureNetworkPallas(state_dim, action_dim, feature_dim,
                                             hidden_dim, k_params, use_bf16=True)
    phi_h, sf_h = net_bf16(state, action)
    jax.block_until_ready((phi_h, sf_h))
    assert jnp.allclose(phi_h, phi_ref, atol=5e-2, rtol=5e-2)
    assert jnp.allclose(sf_h, sf_ref, atol=5e-2, rtol=5e-2)

    print("KERNEL_OK")
</pallas_src>

<mosaic_0001>
module attributes {stable_mosaic.version = 11 : i64} {
  func.func @_fused_kernel(%arg0: i32, %arg1: memref<8x16xf32, #tpu.memory_space<vmem>>, %arg2: memref<8x1xi32, #tpu.memory_space<vmem>>, %arg3: memref<16x64xf32, #tpu.memory_space<vmem>>, %arg4: memref<4x64xf32, #tpu.memory_space<vmem>>, %arg5: memref<1x64xf32, #tpu.memory_space<vmem>>, %arg6: memref<32x128xf32, #tpu.memory_space<vmem>>, %arg7: memref<1x128xf32, #tpu.memory_space<vmem>>, %arg8: memref<32x128xf32, #tpu.memory_space<vmem>>, %arg9: memref<1x128xf32, #tpu.memory_space<vmem>>, %arg10: memref<8x256xf32, #tpu.memory_space<vmem>>) attributes {dimension_semantics = [#tpu.dimension_semantics<parallel>], iteration_bounds = array<i64: 1>, scalar_prefetch = 0 : i64, scratch_operands = 0 : i64, tpu.core_type = #tpu.core_type<tc>, window_params = [{transform_indices = @transform_0, window_bounds = array<i64: 8, 16>}, {transform_indices = @transform_1, window_bounds = array<i64: 8, 1>}, {pipeline_mode = #tpu.pipeline_mode<synchronous>, transform_indices = @transform_2, window_bounds = array<i64: 16, 64>}, {pipeline_mode = #tpu.pipeline_mode<synchronous>, transform_indices = @transform_3, window_bounds = array<i64: 4, 64>}, {pipeline_mode = #tpu.pipeline_mode<synchronous>, transform_indices = @transform_4, window_bounds = array<i64: 1, 64>}, {pipeline_mode = #tpu.pipeline_mode<synchronous>, transform_indices = @transform_5, window_bounds = array<i64: 32, 128>}, {pipeline_mode = #tpu.pipeline_mode<synchronous>, transform_indices = @transform_6, window_bounds = array<i64: 1, 128>}, {pipeline_mode = #tpu.pipeline_mode<synchronous>, transform_indices = @transform_7, window_bounds = array<i64: 32, 128>}, {pipeline_mode = #tpu.pipeline_mode<synchronous>, transform_indices = @transform_8, window_bounds = array<i64: 1, 128>}, {transform_indices = @transform_9, window_bounds = array<i64: 8, 256>}]} {
    %c0 = arith.constant 0 : index
    %c0_0 = arith.constant 0 : index
    %0 = vector.load %arg1[%c0, %c0_0] : memref<8x16xf32, #tpu.memory_space<vmem>>, vector<8x16xf32>
    %c0_1 = arith.constant 0 : index
    %c0_2 = arith.constant 0 : index
    %1 = vector.load %arg2[%c0_1, %c0_2] : memref<8x1xi32, #tpu.memory_space<vmem>>, vector<8x1xi32>
    %2 = tpu.iota {dimensions = array<i32: 1>} : vector<8x4xi32>
    %3 = vector.broadcast %1 : vector<8x1xi32> to vector<8x4xi32>
    %4 = arith.cmpi eq, %2, %3 : vector<8x4xi32>
    %5 = arith.extui %4 : vector<8x4xi1> to vector<8x4xi32>
    %6 = arith.sitofp %5 : vector<8x4xi32> to vector<8x4xf32>
    %c0_3 = arith.constant 0 : index
    %c0_4 = arith.constant 0 : index
    %7 = vector.load %arg3[%c0_3, %c0_4] : memref<16x64xf32, #tpu.memory_space<vmem>>, vector<16x64xf32>
    %cst = arith.constant dense<0.000000e+00> : vector<8x64xf32>
    %8 = tpu.matmul %0, %7, %cst {dimension_numbers = #tpu.dot_dimension_numbers<[1], [0], [0], [1], [0, 0, 1, 1], [], []>} : vector<8x16xf32>, vector<16x64xf32>, vector<8x64xf32> -> vector<8x64xf32>
    %c0_5 = arith.constant 0 : index
    %c0_6 = arith.constant 0 : index
    %9 = vector.load %arg4[%c0_5, %c0_6] : memref<4x64xf32, #tpu.memory_space<vmem>>, vector<4x64xf32>
    %cst_7 = arith.constant dense<0.000000e+00> : vector<8x64xf32>
    %10 = tpu.matmul %6, %9, %cst_7 {dimension_numbers = #tpu.dot_dimension_numbers<[1], [0], [0], [1], [0, 0, 1, 1], [], []>} : vector<8x4xf32>, vector<4x64xf32>, vector<8x64xf32> -> vector<8x64xf32>
    %11 = arith.addf %8, %10 : vector<8x64xf32>
    %c0_8 = arith.constant 0 : index
    %c0_9 = arith.constant 0 : index
    %12 = vector.load %arg5[%c0_8, %c0_9] : memref<1x64xf32, #tpu.memory_space<vmem>>, vector<1x64xf32>
    %13 = vector.broadcast %12 : vector<1x64xf32> to vector<8x64xf32>
    %14 = arith.addf %11, %13 : vector<8x64xf32>
    %cst_10 = arith.constant 0.000000e+00 : f32
    %15 = vector.broadcast %cst_10 : f32 to vector<8x64xf32>
    %16 = arith.maximumf %14, %15 : vector<8x64xf32>
    %17 = vector.extract_strided_slice %16 {offsets = [0, 0], sizes = [8, 32], strides = [1, 1]} : vector<8x64xf32> to vector<8x32xf32>
    %c0_11 = arith.constant 0 : index
    %c0_12 = arith.constant 0 : index
    %18 = vector.load %arg6[%c0_11, %c0_12] : memref<32x128xf32, #tpu.memory_space<vmem>>, vector<32x128xf32>
    %cst_13 = arith.constant dense<0.000000e+00> : vector<8x128xf32>
    %19 = tpu.matmul %17, %18, %cst_13 {dimension_numbers = #tpu.dot_dimension_numbers<[1], [0], [0], [1], [0, 0, 1, 1], [], []>} : vector<8x32xf32>, vector<32x128xf32>, vector<8x128xf32> -> vector<8x128xf32>
    %20 = vector.extract_strided_slice %16 {offsets = [0, 32], sizes = [8, 32], strides = [1, 1]} : vector<8x64xf32> to vector<8x32xf32>
    %c0_14 = arith.constant 0 : index
    %c0_15 = arith.constant 0 : index
    %21 = vector.load %arg8[%c0_14, %c0_15] : memref<32x128xf32, #tpu.memory_space<vmem>>, vector<32x128xf32>
    %cst_16 = arith.constant dense<0.000000e+00> : vector<8x128xf32>
    %22 = tpu.matmul %20, %21, %cst_16 {dimension_numbers = #tpu.dot_dimension_numbers<[1], [0], [0], [1], [0, 0, 1, 1], [], []>} : vector<8x32xf32>, vector<32x128xf32>, vector<8x128xf32> -> vector<8x128xf32>
    %c0_17 = arith.constant 0 : index
    %c0_18 = arith.constant 0 : index
    %23 = vector.load %arg7[%c0_17, %c0_18] : memref<1x128xf32, #tpu.memory_space<vmem>>, vector<1x128xf32>
    %24 = vector.broadcast %23 : vector<1x128xf32> to vector<8x128xf32>
    %25 = arith.addf %19, %24 : vector<8x128xf32>
    %c0_19 = arith.constant 0 : index
    %c0_20 = arith.constant 0 : index
    %26 = vector.load %arg10[%c0_19, %c0_20] : memref<8x256xf32, #tpu.memory_space<vmem>>, vector<8x128xf32>
    tpu.vector_store %arg10[%c0_19, %c0_20], %25 {strides = array<i32>} : memref<8x256xf32, #tpu.memory_space<vmem>>, vector<8x128xf32>,
    %c0_21 = arith.constant 0 : index
    %c0_22 = arith.constant 0 : index
    %27 = vector.load %arg9[%c0_21, %c0_22] : memref<1x128xf32, #tpu.memory_space<vmem>>, vector<1x128xf32>
    %28 = vector.broadcast %27 : vector<1x128xf32> to vector<8x128xf32>
    %29 = arith.addf %22, %28 : vector<8x128xf32>
    %c0_23 = arith.constant 0 : index
    %c128 = arith.constant 128 : index
    %30 = vector.load %arg10[%c0_23, %c128] : memref<8x256xf32, #tpu.memory_space<vmem>>, vector<8x128xf32>
    tpu.vector_store %arg10[%c0_23, %c128], %29 {strides = array<i32>} : memref<8x256xf32, #tpu.memory_space<vmem>>, vector<8x128xf32>,
    return
  }
  func.func @transform_0(%arg0: i32) -> (i32, i32) {
    %c0_i32 = arith.constant 0 : i32
    %c0_i32_0 = arith.constant 0 : i32
    return %arg0, %c0_i32 : i32, i32
  }
  func.func @transform_1(%arg0: i32) -> (i32, i32) {
    %c0_i32 = arith.constant 0 : i32
    %c0_i32_0 = arith.constant 0 : i32
    return %arg0, %c0_i32 : i32, i32
  }
  func.func @transform_2(%arg0: i32) -> (i32, i32) {
    %c0_i32 = arith.constant 0 : i32
    %c0_i32_0 = arith.constant 0 : i32
    %c0_i32_1 = arith.constant 0 : i32
    return %c0_i32, %c0_i32_0 : i32, i32
  }
  func.func @transform_3(%arg0: i32) -> (i32, i32) {
    %c0_i32 = arith.constant 0 : i32
    %c0_i32_0 = arith.constant 0 : i32
    %c0_i32_1 = arith.constant 0 : i32
    return %c0_i32, %c0_i32_0 : i32, i32
  }
  func.func @transform_4(%arg0: i32) -> (i32, i32) {
    %c0_i32 = arith.constant 0 : i32
    %c0_i32_0 = arith.constant 0 : i32
    %c0_i32_1 = arith.constant 0 : i32
    return %c0_i32, %c0_i32_0 : i32, i32
  }
  func.func @transform_5(%arg0: i32) -> (i32, i32) {
    %c0_i32 = arith.constant 0 : i32
    %c0_i32_0 = arith.constant 0 : i32
    %c0_i32_1 = arith.constant 0 : i32
    return %c0_i32, %c0_i32_0 : i32, i32
  }
  func.func @transform_6(%arg0: i32) -> (i32, i32) {
    %c0_i32 = arith.constant 0 : i32
    %c0_i32_0 = arith.constant 0 : i32
    %c0_i32_1 = arith.constant 0 : i32
    return %c0_i32, %c0_i32_0 : i32, i32
  }
  func.func @transform_7(%arg0: i32) -> (i32, i32) {
    %c0_i32 = arith.constant 0 : i32
    %c0_i32_0 = arith.constant 0 : i32
    %c0_i32_1 = arith.constant 0 : i32
    return %c0_i32, %c0_i32_0 : i32, i32
  }
  func.func @transform_8(%arg0: i32) -> (i32, i32) {
    %c0_i32 = arith.constant 0 : i32
    %c0_i32_0 = arith.constant 0 : i32
    %c0_i32_1 = arith.constant 0 : i32
    return %c0_i32, %c0_i32_0 : i32, i32
  }
  func.func @transform_9(%arg0: i32) -> (i32, i32) {
    %c0_i32 = arith.constant 0 : i32
    %c0_i32_0 = arith.constant 0 : i32
    return %arg0, %c0_i32 : i32, i32
  }
}

</mosaic_0001>

<bundles_post_ra>
// kernel: _fused_forward.1
= control target key start
LH: loop header
LB: loop body
LE: loop exit
PB: predicated region body
PF: predicated region fallthrough
CT: control target
= control target key end

     0   :  { %14 = vsyncpa [#allocation3], 0  ;;  %s496_s0 = inlined_call_operand.vmem [shape: f32[8,16], index: 0, kind: input, shape index: {}]   ;;  %s497_s1 = inlined_call_operand.vmem [shape: s32[8,1], index: 1, kind: input, shape index: {}]   ;;  %s498_s2 = inlined_call_operand.hbm [shape: f32[16,64], index: 2, kind: input, shape index: {}]   ;;  %s499_s3 = inlined_call_operand.hbm [shape: f32[4,64], index: 3, kind: input, shape index: {}]   ;;  %s500_s4 = inlined_call_operand.hbm [shape: f32[1,64], index: 4, kind: input, shape index: {}]   ;;  %s501_s5 = inlined_call_operand.hbm [shape: f32[32,128], index: 5, kind: input, shape index: {}]   ;;  %s502_s6 = inlined_call_operand.hbm [shape: f32[1,128], index: 6, kind: input, shape index: {}]   ;;  %s503_s7 = inlined_call_operand.vmem [shape: f32[32,128], index: 7, kind: input, shape index: {}]   ;;  %s504_s8 = inlined_call_operand.vmem [shape: f32[1,128], index: 8, kind: input, shape index: {}]   ;;  %s505_s9 = inlined_call_operand.vmem [shape: f32[8,256], index: 9, kind: output, shape index: {}]  }
   0x1   :  { %15 = vsyncpa [#allocation5], 0  ;;  %s39_s11 = sshll.u32 %s499_s3, 4  ;;  %s40_s11 = int_to_ptr.hbm [resolvable:$true] %s39_s11 }
   0x2   :  { %16 = vsyncpa [#allocation8], 0  ;;  %s394_s12 = smov [#allocation4]   ;;  %s60_s16 = sshll.u32 %s501_s5, 4  ;;  %s61_s16 = int_to_ptr.hbm [resolvable:$true] %s60_s16 }
   0x3   :  { %s41_s13 = sshll.u32 %s394_s12, 4  ;;  %s395_s17 = smov [#allocation7]   ;;  %s42_s13 = int_to_ptr.vmem [resolvable:$true] %s41_s13 }
   0x4   :  { %44 = dma.hbm_to_vmem [thread:$0]  %s40_s11, 64, %s42_s13, [#allocation5]  }
   0x5   :  { %s62_s18 = sshll.u32 %s395_s17, 4  ;;  %s25_s21 = sshll.u32 %s498_s2, 4  ;;  %s63_s18 = int_to_ptr.vmem [resolvable:$true] %s62_s18  ;;  %s26_s21 = int_to_ptr.hbm [resolvable:$true] %s25_s21 }
   0x6   :  { %s396_s3 = smov 128   ;;  %s397_s22 = smov 8  }
   0x7   :  { %68 = dma.hbm_to_vmem [thread:$0]  %s61_s16, 512, %s63_s18, [#allocation8], %s396_s3, %s396_s3, %s397_s22  }
   0x8   :  { %s50_s25 = sshll.u32 %s500_s4, 4  ;;  %s398_s26 = smov [#allocation2]   ;;  %s51_s25 = int_to_ptr.hbm [resolvable:$true] %s50_s25 }
   0x9   :  { %s27_s27 = sshll.u32 %s398_s26, 4  ;;  %s399_s5 = smov [#allocation6]   ;;  %s28_s27 = int_to_ptr.vmem [resolvable:$true] %s27_s27 }
   0xa   :  { %33 = dma.hbm_to_vmem [thread:$0]  %s26_s21, 256, %s28_s27, [#allocation3], %s396_s3, %s396_s3, %s397_s22  }
   0xb   :  { %s52_s28 = sshll.u32 %s399_s5, 4  ;;  %s74_s2 = sshll.u32 %s502_s6, 4  ;;  %s53_s28 = int_to_ptr.vmem [resolvable:$true] %s52_s28  ;;  %s75_s2 = int_to_ptr.hbm [resolvable:$true] %s74_s2 }
   0xc   :  { %55 = dma.hbm_to_vmem [thread:$0]  %s51_s25, 16, %s53_s28, [#allocation5]  }
   0xd   :  { %s400_s10 = smov [#allocation9]  }
   0xe   :  { %s76_s11 = sshll.u32 %s400_s10, 4  ;;  %s77_s11 = int_to_ptr.vmem [resolvable:$true] %s76_s11 }
   0xf   :  { %79 = dma.hbm_to_vmem [thread:$0]  %s75_s2, 16, %s77_s11, [#allocation8]  }
  0x10   :  { %388 = dma.done.wait [#allocation3], 256  }
  0x11   :  { %389 = vsyncadd [#allocation3], 4294967040 }
  0x12   :  { %390 = dma.done.wait [#allocation5], 80  }
  0x13   :  { %391 = vsyncadd [#allocation5], 4294967216 }
  0x14   :  { %392 = dma.done.wait [#allocation8], 528  }
  0x15   :  { %393 = vsyncadd [#allocation8], 4294966768  ;;  %v401_v0 = vmov 0   ;;  %v105_v1 = vld [vmem:[%s497_s1] sm:$0xff]  ;;  %v115_v2 = vld [vmem:[#allocation2 + $0x8] sm:$0xff]  ;;  %vm121_vm0 = vcmask 1043456   ;;  %v106_v6 = vlaneseq }
  0x16   :  { %264 = vset.pattern.permute.xlu0 %v401_v0  ;;  %163 = vmatpush.msra.mxu1 %v115_v2  ;;  %v116_v3 = vld [vmem:[#allocation4] sm:$0xf]  ;;  %v114_v4 = vld [vmem:[#allocation2] sm:$0xff]  ;;  %vm145_vm1 = vcmask 130048   ;;  %vm117_vm2 = vcmask 31744   ;;  %v402_v9 = vmov 0.0  }
  0x17   :  { %109 = vperm.xlu0 %264, %v105_v1   ;;  %249 = vmatpush.msk.msra.mxu0 %vm121_vm0, %v116_v3  ;;  %v104_v5 = vld [vmem:[%s496_s0] sm:$0xff]  ;;  %v107_v7 = vand.u32 127, %v106_v6  ;;  %v178_v11 = vld [vmem:[#allocation7 + $0x18] sm:$0xff]  ;;  %v175_v14 = vld [vmem:[#allocation7] sm:$0xff]  ;;  %vm187_vm4 = vcmask 261120   ;;  %s403_s20 = smov 96  }
  0x18   :  { %164 = vmatpush.msra.mxu1 %v114_v4  ;;  %203 = vmatpush.msra.mxu2 %v178_v11  ;;  %v177_v12 = vld [vmem:[#allocation7 + $0x10] sm:$0xff]  ;;  %v176_v13 = vld [vmem:[#allocation7 + $0x8] sm:$0xff]  ;;  %v181_v16 = vld [vmem:[%s503_s7 + $0x10] sm:$0xff] }
  0x19   :  { %251 = vmatmul.msk.f32.vlgmr.msra.gmra.mxu1 %vm145_vm1, %v104_v5  ;;  %v182_v15 = vld [vmem:[%s503_s7 + $0x18] sm:$0xff]  ;;  %v180_v17 = vld [vmem:[%s503_s7 + $0x8] sm:$0xff]  ;;  %v179_v18 = vld [vmem:[%s503_s7] sm:$0xff] }
  0x1a   :  { %204 = vmatpush.msra.mxu2 %v177_v12  ;;  %232 = vmatpush.msra.mxu3 %v182_v15  ;;  %v265_v20 = vld [vmem:[#allocation6] ss:$0 sm:$0xff]  ;;  %v266_v26 = vld [vmem:[#allocation9] ss:$0 sm:$0xff]  ;;  %v267_v29 = vld [vmem:[%s504_s8] ss:$0 sm:$0xff] }
  0x1c   :  { %205 = vmatpush.msra.mxu2 %v176_v13  ;;  %233 = vmatpush.msra.mxu3 %v181_v16 }
  0x1e   :  { %206 = vmatpush.msra.mxu2 %v175_v14  ;;  %234 = vmatpush.msra.mxu3 %v180_v17 }
  0x20   :  { %235 = vmatpush.msra.mxu3 %v179_v18 }
  0x89   :  { %v110_v8 = vpop.permute.xlu0 %109 }
  0x8a   :  { %vm111_vm3 = vcmp.eq.s32.totalorder %v107_v7, %v110_v8 }
  0x8b   :  { %v248_v10 = vsel %vm111_vm3, 1.0, %v402_v9 }
  0x8c   :  { %250 = vmatmul.msk.f32.vlgmr.msra.gmra.mxu0 %vm117_vm2, %v248_v10 }
  0x96   :  { %v166_v19 = vpop.f32.mrf.mxu1 }
 0x109   :  { %v142_v21 = vpop.f32.mrf.mxu0 }
 0x10a   :  { %v167_v22 = vadd.f32 %v166_v19, %v142_v21 }
 0x10c   :  { %v173_v23 = vadd.f32 %v265_v20, %v167_v22 }
 0x10e   :  { %v174_v24 = vmax.f32 %v173_v23, 0.0 }
 0x110   :  { %216 = vrot.lane.b32.xlu0 %v174_v24, %s403_s20  ;;  %252 = vmatmul.msk.f32.vlgmr.msra.gmra.mxu2 %vm187_vm4, %v174_v24 }
 0x182   :  { %v217_v25 = vpop.permute.xlu0 %216 }
 0x183   :  { %253 = vmatmul.msk.f32.vlgmr.msra.gmra.mxu3 %vm187_vm4, %v217_v25 }
 0x193   :  { %v208_v27 = vpop.f32.mrf.mxu2 }
 0x194   :  { %v209_v28 = vadd.f32 %v266_v26, %v208_v27 }
 0x196   :  { %211 = vst [vmem:[%s505_s9] sm:$0xff] %v209_v28 }
 0x206   :  { %v237_v30 = vpop.f32.mrf.mxu3 }
 0x207   :  { %v238_v31 = vadd.f32 %v267_v29, %v237_v30 }
 0x209   :  { %240 = vst [vmem:[%s505_s9 + $0x8] sm:$0xff] %v238_v31 }
 0x20a   :  { %245 = vsyncpa [#allocation3], 1 }
 0x20b   :  { %246 = vsyncpa [#allocation5], 1 }
 0x20c   :  { %247 = vsyncpa [#allocation8], 1 }

</bundles_post_ra>
